<compile_context>
chip_gen: v5e
topology: v5e:2x2
jax: 0.10.0
libtpu: 0.0.40
codegen_flags: <defaults>
</compile_context>

<pallas_src>
import functools

import jax
import jax.numpy as jnp
from jax import lax
from jax.experimental import pallas as pl
from jax.experimental.pallas import tpu as pltpu


_LANE = 128
# ~4 MiB per (T, TP) f32 input block -> ~8 MiB double-buffered input traffic:
# fits scoped VMEM on v5e/v6e/v7x while amortizing the ~0.35 us per-grid-step
# overhead (MB-scale payload per step -> near HBM roofline).
_VMEM_BUDGET_PER_BUF = 4 * 1024 * 1024


# ----------------------------- Pallas kernel ------------------------------

def _gram_kernel(g_ref, out_ref):
    """Accumulate one (T, T) partial Gram matrix per leading-grid split.

    grid = (splits, chunks_per_split); the output block index depends only on
    the leading (parallel) axis, so the (1, T, T) block stays VMEM-resident
    across the inner (arbitrary) reduction axis and acts as the accumulator.
    """
    k = pl.program_id(1)

    @pl.when(k == 0)
    def _():
        out_ref[...] = jnp.zeros_like(out_ref)

    g = g_ref[...]                                             # (T, TP) f32
    # Contract both operands over the lane (P) axis:  g @ g^T  on the MXU.
    gram = lax.dot_general(g, g, (((1,), (1,)), ((), ())),
                           preferred_element_type=jnp.float32)  # (T, T)
    out_ref[...] += gram[None, :, :]


# ------------------------------ JAX wrappers -------------------------------

def _plan_tiles(T, P):
    """Pick (tp, P_pad, splits, chunks_per_split) for the Gram kernel."""
    max_tp = max(_LANE, (_VMEM_BUDGET_PER_BUF // (T * 4)) // _LANE * _LANE)
    p_lane = -(-P // _LANE) * _LANE
    if p_lane <= max_tp:
        # Whole (padded) matrix fits one block: single DMA, no per-step
        # overhead, no accumulator writeback traffic.
        return p_lane, p_lane, 1, 1
    tp = max_tp
    n_chunks = -(-P // tp)
    splits = 2 if n_chunks >= 2 else 1     # megacore split of the P reduction
    n_chunks = -(-n_chunks // splits) * splits
    return tp, n_chunks * tp, splits, n_chunks // splits


def _gram(g_pad, tp, splits, cps):
    """G = g_pad @ g_pad^T via a single streaming Pallas pass."""
    T = g_pad.shape[0]
    partials = pl.pallas_call(
        _gram_kernel,
        out_shape=jax.ShapeDtypeStruct((splits, T, T), jnp.float32),
        grid_spec=pltpu.PrefetchScalarGridSpec(
            num_scalar_prefetch=0,
            grid=(splits, cps),
            in_specs=[pl.BlockSpec(
                (T, tp), lambda c, k, _cps=cps: (0, c * _cps + k))],
            out_specs=pl.BlockSpec((1, T, T), lambda c, k: (c, 0, 0)),
        ),
        compiler_params=pltpu.CompilerParams(
            dimension_semantics=("parallel", "arbitrary"),
            vmem_limit_bytes=32 * 1024 * 1024),
    )(g_pad)
    return jnp.sum(partials, axis=0)                           # (T, T)


def imtl_forward(shared_params, task_loss_fns, s_t, method="hybrid"):
    """JAX/Pallas equivalent of IMTL.forward.

    shared_params: pytree of shared parameters.
    task_loss_fns: list of T callables, each params -> scalar raw loss l_i.
    s_t:           (T,) float32 task-balance parameters.
    Returns (weighted_total_loss, L_t) per the reference semantics.
    """
    T = len(task_loss_fns)

    if method == "loss":
        # Only the scaled losses are returned; skip the gradient/alpha work.
        losses = jnp.stack([fn(shared_params) for fn in task_loss_fns])
        return None, losses * jnp.exp(s_t) - s_t

    def task_objective(params, i):
        # The loss whose gradient IMTL balances: scaled for 'hybrid',
        # raw for 'gradient' (matches the reference L_t construction).
        l = task_loss_fns[i](params)
        if method == "hybrid":
            return l * jnp.exp(s_t[i]) - s_t[i]
        return l

    # Flattened per-task gradients; the zero tail (padding P up to the lane
    # tile) is folded into the same concatenation -> single materialization.
    leaves0 = jax.tree_util.tree_leaves(shared_params)
    P = int(sum(l.size for l in leaves0))
    tp, P_pad, splits, cps = _plan_tiles(T, P)
    pad = P_pad - P

    vals, flats = [], []
    for i in range(T):
        val, gi = jax.value_and_grad(
            functools.partial(task_objective, i=i))(shared_params)
        vals.append(val)
        parts = [jnp.ravel(g).astype(jnp.float32)
                 for g in jax.tree_util.tree_leaves(gi)]
        if pad:
            parts.append(jnp.zeros((pad,), jnp.float32))
        flats.append(jnp.concatenate(parts))
    L_t = jnp.stack(vals)                                      # (T,)
    g_pad = jnp.stack(flats)                                   # (T, P_pad)

    # --- Pallas hot path: one streaming Gram pass over HBM ---
    G = _gram(g_pad, tp, splits, cps)                          # (T, T)

    # Tiny (T x T) algebra in glue (exactly what the reference computes):
    #   u_i = g_i / ||g_i||,  D = g_0 - g_{1:},  U = u_0 - u_{1:}
    #   D @ U^T and g_0 @ U^T follow from G[i, j] = <g_i, g_j>.
    if T == 1:
        alpha = jnp.ones((1,), jnp.float32)
    else:
        diag = jnp.diagonal(G)
        norms = jnp.sqrt(jnp.maximum(diag, 0.0))
        inv_n = 1.0 / jnp.maximum(norms, 1e-12)  # guard for zero gradients
        Gs = G * inv_n[None, :]                                # <g_i, u_j>
        A = Gs[0:1, :] - Gs[1:, :]                             # <g_0-g_i, u_j>
        DUT = A[:, 0:1] - A[:, 1:]                 # (T-1, T-1) = D @ U^T
        b = Gs[0, 0:1] - Gs[0, 1:]                 # (T-1,)     = g_0 @ U^T

        # alpha_2T = (g_0 U^T) (D U^T)^{-1}  (row-vector solve)
        alpha_2T = jnp.linalg.solve(DUT.T, b)                  # (T-1,)
        alpha = jnp.concatenate(
            [1.0 - jnp.sum(alpha_2T, keepdims=True), alpha_2T])  # (T,)

    weighted = jnp.sum(L_t * alpha)

    if method == "hybrid":
        return weighted, L_t
    elif method == "gradient":
        return weighted, None
    raise ValueError(method)


# --------------------------------- Demo ------------------------------------

if __name__ == "__main__":
    key = jax.random.PRNGKey(0)
    k_w, k_b, k_x, k_t = jax.random.split(key, 4)

    T = 4          # number of losses / tasks
    B, D_in, D_out = 8, 32, 32

    # Shared parameters of a tiny linear model y = x @ W + b.
    W = jax.random.normal(k_w, (D_in, D_out), jnp.float32) * 0.1
    bvec = jax.random.normal(k_b, (D_out,), jnp.float32) * 0.1
    shared_params = {"W": W, "b": bvec}

    x = jax.random.normal(k_x, (B, D_in), jnp.float32)
    targets = jax.random.normal(k_t, (T, B, D_out), jnp.float32)

    def make_task_loss(i):
        def loss_fn(params):
            y = x @ params["W"] + params["b"]
            return jnp.mean((y - targets[i]) ** 2)
        return loss_fn

    task_loss_fns = [make_task_loss(i) for i in range(T)]

    # IMTL.__init__: s_t initialized to ones (init_val=None, num_losses=T).
    s_t = jnp.ones((T,), jnp.float32)

    weighted, L_t = imtl_forward(shared_params, task_loss_fns, s_t,
                                 method="hybrid")
    weighted = jax.block_until_ready(weighted)
    L_t = jax.block_until_ready(L_t)

    assert weighted.shape == ()
    assert L_t.shape == (T,)
    assert bool(jnp.isfinite(weighted)) and bool(jnp.all(jnp.isfinite(L_t)))
    print("KERNEL_OK")
</pallas_src>

<mosaic_0001>
module attributes {stable_mosaic.version = 11 : i64} {
  func.func @_gram_kernel(%arg0: i32, %arg1: i32, %arg2: memref<4x1152xf32, #tpu.memory_space<vmem>>, %arg3: memref<1x4x4xf32, #tpu.memory_space<vmem>>) attributes {dimension_semantics = [#tpu.dimension_semantics<parallel>, #tpu.dimension_semantics<arbitrary>], iteration_bounds = array<i64: 1, 1>, scalar_prefetch = 0 : i64, scratch_operands = 0 : i64, tpu.core_type = #tpu.core_type<tc>, window_params = [{transform_indices = @transform_0, window_bounds = array<i64: 4, 1152>}, {transform_indices = @transform_1, window_bounds = array<i64: 1, 4, 4>}]} {
    %c0_i32 = arith.constant 0 : i32
    %0 = arith.cmpi eq, %arg1, %c0_i32 : i32
    %1 = arith.extui %0 : i1 to i32
    %c0_i32_0 = arith.constant 0 : i32
    %2 = arith.cmpi ne, %1, %c0_i32_0 : i32
    scf.if %2 {
      %cst_8 = arith.constant 0.000000e+00 : f32
      %9 = vector.broadcast %cst_8 : f32 to vector<1x4x4xf32>
      %c0_9 = arith.constant 0 : index
      %c0_10 = arith.constant 0 : index
      %c0_11 = arith.constant 0 : index
      %10 = vector.load %arg3[%c0_9, %c0_10, %c0_11] : memref<1x4x4xf32, #tpu.memory_space<vmem>>, vector<1x4x4xf32>
      tpu.vector_store %arg3[%c0_9, %c0_10, %c0_11], %9 {strides = array<i32>} : memref<1x4x4xf32, #tpu.memory_space<vmem>>, vector<1x4x4xf32>,
    } else {
    }
    %c0 = arith.constant 0 : index
    %c0_1 = arith.constant 0 : index
    %3 = vector.load %arg2[%c0, %c0_1] : memref<4x1152xf32, #tpu.memory_space<vmem>>, vector<4x1152xf32>
    %cst = arith.constant dense<0.000000e+00> : vector<4x4xf32>
    %4 = tpu.matmul %3, %3, %cst {dimension_numbers = #tpu.dot_dimension_numbers<[1], [1], [0], [0], [0, 0, 1, 0], [], []>} : vector<4x1152xf32>, vector<4x1152xf32>, vector<4x4xf32> -> vector<4x4xf32>
    %c0_2 = arith.constant 0 : index
    %c0_3 = arith.constant 0 : index
    %c0_4 = arith.constant 0 : index
    %5 = vector.load %arg3[%c0_2, %c0_3, %c0_4] : memref<1x4x4xf32, #tpu.memory_space<vmem>>, vector<1x4x4xf32>
    %6 = vector.shape_cast %4 : vector<4x4xf32> to vector<1x4x4xf32>
    %7 = arith.addf %5, %6 : vector<1x4x4xf32>
    %c0_5 = arith.constant 0 : index
    %c0_6 = arith.constant 0 : index
    %c0_7 = arith.constant 0 : index
    %8 = vector.load %arg3[%c0_5, %c0_6, %c0_7] : memref<1x4x4xf32, #tpu.memory_space<vmem>>, vector<1x4x4xf32>
    tpu.vector_store %arg3[%c0_5, %c0_6, %c0_7], %7 {strides = array<i32>} : memref<1x4x4xf32, #tpu.memory_space<vmem>>, vector<1x4x4xf32>,
    return
  }
  func.func @transform_0(%arg0: i32, %arg1: i32) -> (i32, i32) {
    %c1_i32 = arith.constant 1 : i32
    %0 = arith.muli %arg0, %c1_i32 : i32
    %1 = arith.addi %0, %arg1 : i32
    %c0_i32 = arith.constant 0 : i32
    %c0_i32_0 = arith.constant 0 : i32
    return %c0_i32, %1 : i32, i32
  }
  func.func @transform_1(%arg0: i32, %arg1: i32) -> (i32, i32, i32) {
    %c0_i32 = arith.constant 0 : i32
    %c0_i32_0 = arith.constant 0 : i32
    %c0_i32_1 = arith.constant 0 : i32
    return %arg0, %c0_i32, %c0_i32_0 : i32, i32, i32
  }
}

</mosaic_0001>

<bundles_post_ra>
// kernel: tpu_custom_call.1
= control target key start
LH: loop header
LB: loop body
LE: loop exit
PB: predicated region body
PF: predicated region fallthrough
CT: control target
= control target key end

     0   :  { %6 = vsyncpa [#allocation3], 0  ;;  %s374_s0 = inlined_call_operand.hbm [shape: f32[4,1152], index: 0, kind: input, shape index: {}]   ;;  %s375_s1 = inlined_call_operand.hbm [shape: f32[1,4,4], index: 1, kind: output, shape index: {}]  }
   0x1   :  { %7 = vsyncpa [#allocation4], 0  ;;  %s17_s8 = sshll.u32 %s374_s0, 4  ;;  %s353_s9 = smov [#allocation2]   ;;  %s18_s8 = int_to_ptr.hbm [resolvable:$true] %s17_s8 }
   0x2   :  { %s19_s10 = sshll.u32 %s353_s9, 4  ;;  %s20_s10 = int_to_ptr.vmem [resolvable:$true] %s19_s10 }
   0x3   :  { %22 = dma.hbm_to_vmem [thread:$0]  %s18_s8, 576, %s20_s10, [#allocation3]  }
   0x4   :  { %349 = dma.done.wait [#allocation3], 576  }
   0x5   :  { %350 = vsyncadd [#allocation3], 4294966720  ;;  %v36_v0 = vld [vmem:[#allocation2 + $0x8] sm:$0xff]  ;;  %v35_v1 = vld [vmem:[#allocation2] sm:$0xff]  ;;  %vm33_vm0 = vcmask 27648   ;;  %v354_v23 = vmov 0.0  }
   0x6   :  { %47 = vst [vmem:[#allocation1 + $0x10] ss:$2 sm:$0xff] %v36_v0  ;;  %v38_v2 = vld [vmem:[#allocation2 + $0x18] sm:$0xff]  ;;  %v37_v3 = vld [vmem:[#allocation2 + $0x10] sm:$0xff]  ;;  %v39_v4 = vld [vmem:[#allocation2 + $0x20] sm:$0xf] }
   0x7   :  { %45 = vst [vmem:[#allocation1] ss:$2 sm:$0xff] %v35_v1  ;;  %s355_s0 = smov [#allocation5]   ;;  %s288_s14 = sshll.u32 %s375_s1, 4  ;;  %s289_s14 = int_to_ptr.hbm [resolvable:$true] %s288_s14 }
   0x8   :  { %51 = vst [vmem:[#allocation1 + $0x30] ss:$2 sm:$0xff] %v38_v2  ;;  %s286_s11 = sshll.u32 %s355_s0, 4  ;;  %s287_s11 = int_to_ptr.vmem [resolvable:$true] %s286_s11 }
   0x9   :  { %49 = vst [vmem:[#allocation1 + $0x20] ss:$2 sm:$0xff] %v37_v3 }
   0xa   :  { %34 = vst.msk [vmem:[#allocation5] sm:$0xf] %vm33_vm0, %v354_v23 }
   0xd   :  { %v54_v5 = vld.sshfl [vmem:[#allocation1 + $0x10] sm:$0xff pattern:$0x75316420]  ;;  %v55_v6 = vld.sshfl [vmem:[#allocation1 + $0x18] sm:$0xff pattern:$0x75316420] }
   0xe   :  { %73 = vst [vmem:[#allocation1 + $0x10] ss:$2 sm:$0xff] %v36_v0  ;;  %v52_v7 = vld.sshfl [vmem:[#allocation1] sm:$0xff pattern:$0x75316420] }
   0xf   :  { %v53_v8 = vld.sshfl [vmem:[#allocation1 + $0x8] sm:$0xff pattern:$0x75316420]  ;;  %v58_v9 = vld.sshfl [vmem:[#allocation1 + $0x30] sm:$0xff pattern:$0x75316420] }
  0x10   :  { %60 = vst [vmem:[#allocation1] ss:$2 sm:$0xff] %v39_v4  ;;  %v59_v10 = vld.sshfl [vmem:[#allocation1 + $0x38] sm:$0xff pattern:$0x75316420] }
  0x11   :  { %77 = vst [vmem:[#allocation1 + $0x30] ss:$2 sm:$0xff] %v38_v2  ;;  %v56_v11 = vld.sshfl [vmem:[#allocation1 + $0x20] sm:$0xff pattern:$0x75316420] }
  0x12   :  { %v57_v12 = vld.sshfl [vmem:[#allocation1 + $0x28] sm:$0xff pattern:$0x75316420] }
  0x13   :  { %75 = vst [vmem:[#allocation1 + $0x20] ss:$2 sm:$0xff] %v37_v3  ;;  %v277_v40 = vld [vmem:[#allocation5] sm:$0xf] }
  0x15   :  { %v80_v13 = vld.sshfl [vmem:[#allocation1 + $0x10] sm:$0xff pattern:$0x75316420]  ;;  %v81_v14 = vld.sshfl [vmem:[#allocation1 + $0x18] sm:$0xff pattern:$0x75316420] }
  0x16   :  { %152 = vmatpush.xpose.msra.mxu2 %v80_v13  ;;  %172 = vmatpush.xpose.msra.mxu3 %v81_v14 }
  0x17   :  { %v61_v15 = vld.sshfl [vmem:[#allocation1] sm:$0xff pattern:$0x75316420] }
  0x18   :  { %71 = vst [vmem:[#allocation1] ss:$2 sm:$0xff] %v35_v1  ;;  %v84_v16 = vld.sshfl [vmem:[#allocation1 + $0x30] sm:$0xff pattern:$0x75316420] }
  0x19   :  { %153 = vmatmul.f32.vlgmr.msra.gmra.mxu2 %v54_v5  ;;  %173 = vmatmul.f32.vlgmr.msra.gmra.mxu3 %v55_v6  ;;  %v85_v17 = vld.sshfl [vmem:[#allocation1 + $0x38] sm:$0xff pattern:$0x75316420] }
  0x1a   :  { %232 = vmatpush.xpose.msrb.mxu2 %v84_v16  ;;  %252 = vmatpush.xpose.msrb.mxu3 %v85_v17  ;;  %v82_v18 = vld.sshfl [vmem:[#allocation1 + $0x20] sm:$0xff pattern:$0x75316420]  ;;  %v83_v19 = vld.sshfl [vmem:[#allocation1 + $0x28] sm:$0xff pattern:$0x75316420] }
  0x1f   :  { %v78_v20 = vld.sshfl [vmem:[#allocation1] sm:$0xff pattern:$0x75316420]  ;;  %v79_v21 = vld.sshfl [vmem:[#allocation1 + $0x8] sm:$0xff pattern:$0x75316420] }
  0x20   :  { %112 = vmatpush.xpose.msra.mxu0 %v78_v20  ;;  %86 = vst [vmem:[#allocation1] ss:$2 sm:$0xff] %v39_v4  ;;  %132 = vmatpush.xpose.msra.mxu1 %v79_v21 }
  0x21   :  { %233 = vmatmul.f32.vlgmr.msrb.gmra.mxu2 %v58_v9  ;;  %253 = vmatmul.f32.vlgmr.msrb.gmra.mxu3 %v59_v10 }
  0x23   :  { %113 = vmatmul.f32.vlgmr.msra.gmra.mxu0 %v52_v7  ;;  %133 = vmatmul.f32.vlgmr.msra.gmra.mxu1 %v53_v8 }
  0x24   :  { %192 = vmatpush.xpose.msrb.mxu0 %v82_v18  ;;  %212 = vmatpush.xpose.msrb.mxu1 %v83_v19 }
  0x27   :  { %v87_v22 = vld.sshfl [vmem:[#allocation1] sm:$0xff pattern:$0x75316420] }
  0x28   :  { %272 = vmatpush.xpose.msra.mxu0 %v87_v22 }
  0x2b   :  { %193 = vmatmul.f32.vlgmr.msrb.gmra.mxu0 %v56_v11  ;;  %213 = vmatmul.f32.vlgmr.msrb.gmra.mxu1 %v57_v12 }
  0x33   :  { %273 = vmatmul.f32.vlgmr.msra.gmra.mxu0 %v61_v15 }
  0x9c   :  { %v154_v24 = vpop.f32.mrf.mxu2  ;;  %v174_v29 = vpop.f32.mrf.mxu3 }
  0xa0   :  { %v114_v25 = vpop.f32.mrf.mxu0  ;;  %v134_v26 = vpop.f32.mrf.mxu1 }
  0xa1   :  { %v135_v27 = vadd.f32 %v134_v26, %v114_v25 }
  0xa3   :  { %v155_v28 = vadd.f32 %v154_v24, %v135_v27 }
  0xa4   :  { %v234_v34 = vpop.f32.mrf.mxu2  ;;  %v254_v36 = vpop.f32.mrf.mxu3 }
  0xa5   :  { %v175_v30 = vadd.f32 %v174_v29, %v155_v28 }
  0xa8   :  { %v194_v31 = vpop.f32.mrf.mxu0  ;;  %v214_v32 = vpop.f32.mrf.mxu1 }
  0xa9   :  { %v195_v33 = vadd.f32 %v194_v31, %v175_v30 }
  0xab   :  { %v215_v35 = vadd.f32 %v214_v32, %v195_v33 }
  0xad   :  { %v235_v37 = vadd.f32 %v234_v34, %v215_v35 }
  0xaf   :  { %v255_v38 = vadd.f32 %v254_v36, %v235_v37 }
  0xb0   :  { %v274_v39 = vpop.f32.mrf.mxu0 }
  0xb1   :  { %v275_v41 = vadd.f32 %v274_v39, %v255_v38 }
  0xb3   :  { %v278_v42 = vadd.f32 %v277_v40, %v275_v41 }
  0xb5   :  { %280 = vst.msk [vmem:[#allocation5] sm:$0xf] %vm33_vm0, %v278_v42 }
  0xb6   :  { %291 = dma.vmem_to_hbm [thread:$0]  %s287_s11, 64, %s289_s14, [#allocation4]  }
  0xb7   :  { %351 = dma.done.wait [#allocation4], 64  }
  0xb8   :  { %352 = vsyncadd [#allocation4], 4294967232 }
  0xb9   :  { %296 = vsyncpa [#allocation3], 1 }
  0xba   :  { %297 = vsyncpa [#allocation4], 1 }

</bundles_post_ra>
